<compile_context>
chip_gen: v5e
topology: v5e:2x2
jax: 0.10.0
libtpu: 0.0.40
codegen_flags: <defaults>
</compile_context>

<pallas_src>
import jax
import jax.numpy as jnp
from jax.experimental import pallas as pl
from jax.experimental.pallas import tpu as pltpu

_MIB = 1024 * 1024


def _add_inverse_kernel(x_ref, o_ref):
    # x_ref: (tile_b, tile_r, L) VMEM tile
    # o_ref: (tile_b, 2, tile_r, L) VMEM tile; [:, 0] = x, [:, 1] = 1 - x
    x = x_ref[...]
    one = jnp.asarray(1, dtype=x.dtype)   # pin literal to input dtype
    o_ref[:, 0, :, :] = x
    o_ref[:, 1, :, :] = one - x


def _add_inverse_kernel_2d(x_ref, o_ref):
    # Fallback path: x_ref (B, tile_l); o_ref (B, 2, tile_l)
    x = x_ref[...]
    one = jnp.asarray(1, dtype=x.dtype)
    o_ref[:, 0, :] = x
    o_ref[:, 1, :] = one - x


def _tpu_vmem_bytes():
    """Physical VMEM capacity; conservative (v7x-sized) fallback on failure."""
    try:
        return int(pltpu.get_tpu_info().vmem_capacity_bytes)
    except Exception:
        return 64 * _MIB


def _round_up(x, m):
    return (x + m - 1) // m * m


def _pick_lanes(chw, min_rows, max_lanes=4096):
    """Largest multiple-of-128 divisor of chw (capped), preferring choices
    that leave at least `min_rows` sublane rows so vregs are densely packed.
    Returns None if chw has no multiple-of-128 divisor."""
    cands = [l for l in range(128, min(chw, max_lanes) + 1, 128) if chw % l == 0]
    if not cands:
        return None
    pref = [l for l in cands if (chw // l) >= min_rows]
    return max(pref) if pref else max(cands)


def _pick_tile_rows(n_rows, row_bytes, sublane_mult, budget_bytes):
    """Largest legal sublane tile (multiple of sublane_mult, or the full dim)
    that keeps the input tile within the byte budget."""
    cands = [r for r in range(sublane_mult, n_rows + 1, sublane_mult)
             if n_rows % r == 0]
    if n_rows not in cands:
        cands.append(n_rows)
    within = [r for r in cands if r * row_bytes <= budget_bytes]
    return max(within) if within else min(cands)


def _pick_tile_batch(batch, bytes_per_batch, r_blocks, budget_bytes, min_steps):
    """Fuse batch rows per step up to the byte budget.  On megacore chips
    (min_steps=2) keep at least `min_steps` grid steps when possible so both
    TensorCores get work; on single-TC chips just take the largest tile."""
    divs = [d for d in range(1, batch + 1)
            if batch % d == 0 and d * bytes_per_batch <= budget_bytes]
    if not divs:
        return 1
    pref = [d for d in divs if (batch // d) * r_blocks >= min_steps]
    return max(pref) if pref else max(divs)


def add_inverse(x, *, tile_budget_bytes=None):
    """x: (B, C, H, W) -> (B, 2C, H, W), equivalent to torch.cat([x, 1-x], 1)."""
    B, C, H, W = x.shape
    chw = C * H * W
    itemsize = jnp.dtype(x.dtype).itemsize
    # min sublane multiple: 8 for f32, 16 for bf16, 32 for int8/fp8
    sublane_mult = max(8, 32 // itemsize)

    # Generation-aware budgets: v7x-class (64 MiB VMEM, 2 TensorCores) gets a
    # 4 MiB input tile and a >=2-step grid; v5e/v6e-class (128 MiB VMEM, 1 TC)
    # gets an 8 MiB input tile and the largest fused tile.
    vmem_bytes = _tpu_vmem_bytes()
    is_small_vmem = vmem_bytes <= 64 * _MIB
    if tile_budget_bytes is None:
        tile_budget_bytes = 4 * _MIB if is_small_vmem else 8 * _MIB
    min_steps = 2 if is_small_vmem else 1

    # Double-buffered footprint: 2 * (input tile + 2x output tile) = 6x the
    # input budget; add headroom but stay well under physical VMEM.
    vmem_limit = min(int(6 * tile_budget_bytes * 1.25) + 2 * _MIB,
                     int(vmem_bytes * 0.75))

    # Advisory hint for XLA's scheduler: 1 sub per element, 3 bytes/element.
    cost = pl.CostEstimate(flops=B * chw, transcendentals=0,
                           bytes_accessed=3 * B * chw * itemsize)

    L = _pick_lanes(chw, min_rows=sublane_mult)

    if L is None:
        # Fallback: C*H*W has no multiple-of-128 divisor.  View the input as
        # (B, chw), tile the flat CHW axis in lane-dense multiple-of-128
        # chunks, and let Pallas mask the tail block (instead of the previous
        # sublane-1 / masked-lane layout).
        tile_l = min(_round_up(chw, 128),
                     max(128, (tile_budget_bytes // (B * itemsize)) // 128 * 128))
        l_blocks = pl.cdiv(chw, tile_l)
        out3 = pl.pallas_call(
            _add_inverse_kernel_2d,
            out_shape=jax.ShapeDtypeStruct((B, 2, chw), x.dtype),
            grid=(l_blocks,),
            in_specs=[pl.BlockSpec((B, tile_l), lambda l: (0, l))],
            out_specs=pl.BlockSpec((B, 2, tile_l), lambda l: (0, 0, l)),
            compiler_params=pltpu.CompilerParams(
                dimension_semantics=("parallel",),
                vmem_limit_bytes=vmem_limit,
            ),
            cost_estimate=cost,
        )(x.reshape(B, chw))
        # (B, 2, chw) and (B, 2C, H, W) share the same row-major layout.
        return out3.reshape(B, 2 * C, H, W)

    R = chw // L
    tile_r = _pick_tile_rows(R, L * itemsize, sublane_mult, tile_budget_bytes)
    r_blocks = R // tile_r
    tile_b = _pick_tile_batch(B, tile_r * L * itemsize, r_blocks,
                              tile_budget_bytes, min_steps)
    b_blocks = B // tile_b

    # Megacore guarantee (v7x): if only one grid step remains, split the row
    # axis (when legal) so both TensorCores get work.
    if min_steps > 1 and b_blocks * r_blocks < min_steps:
        cands = [r for r in range(sublane_mult, R, sublane_mult) if R % r == 0]
        if cands:
            tile_r = max(cands)
            r_blocks = R // tile_r

    x3 = x.reshape(B, R, L)  # free reshape (same row-major layout)

    out4 = pl.pallas_call(
        _add_inverse_kernel,
        out_shape=jax.ShapeDtypeStruct((B, 2, R, L), x.dtype),
        grid=(b_blocks, r_blocks),
        in_specs=[pl.BlockSpec((tile_b, tile_r, L), lambda b, r: (b, r, 0))],
        out_specs=pl.BlockSpec((tile_b, 2, tile_r, L),
                               lambda b, r: (b, 0, r, 0)),
        compiler_params=pltpu.CompilerParams(
            dimension_semantics=("parallel", "parallel"),
            vmem_limit_bytes=vmem_limit,
        ),
        cost_estimate=cost,
    )(x3)

    # (B, 2, R, L) and (B, 2C, H, W) share the same row-major layout.
    return out4.reshape(B, 2 * C, H, W)
    # TODO(synk): the only change that can beat the 3-bytes/element HBM
    # roofline is fusing this op into its producer/consumer kernel.


if __name__ == "__main__":
    key = jax.random.PRNGKey(0)
    B, C, H, W = 2, 4, 16, 16
    x = jax.random.uniform(key, (B, C, H, W), dtype=jnp.float32)

    out = add_inverse(x)
    out = jax.block_until_ready(out)

    # reference check in plain JAX
    ref = jnp.concatenate([x, 1.0 - x], axis=1)
    assert out.shape == (B, 2 * C, H, W)
    assert jnp.allclose(out, ref), "mismatch vs reference"

    print("KERNEL_OK")
</pallas_src>

<mosaic_0001>
module attributes {stable_mosaic.version = 11 : i64} {
  func.func @_add_inverse_kernel(%arg0: i32, %arg1: i32, %arg2: memref<1x8x128xf32, #tpu.memory_space<vmem>>, %arg3: memref<1x2x8x128xf32, #tpu.memory_space<vmem>>) attributes {dimension_semantics = [#tpu.dimension_semantics<parallel>, #tpu.dimension_semantics<parallel>], iteration_bounds = array<i64: 2, 1>, scalar_prefetch = 0 : i64, scratch_operands = 0 : i64, tpu.core_type = #tpu.core_type<tc>, window_params = [{transform_indices = @transform_0, window_bounds = array<i64: 1, 8, 128>}, {transform_indices = @transform_1, window_bounds = array<i64: 1, 2, 8, 128>}]} {
    %c0 = arith.constant 0 : index
    %c0_0 = arith.constant 0 : index
    %c0_1 = arith.constant 0 : index
    %0 = vector.load %arg2[%c0, %c0_0, %c0_1] : memref<1x8x128xf32, #tpu.memory_space<vmem>>, vector<1x8x128xf32>
    %c0_2 = arith.constant 0 : index
    %c0_3 = arith.constant 0 : index
    %c0_4 = arith.constant 0 : index
    %c0_5 = arith.constant 0 : index
    %1 = vector.load %arg3[%c0_2, %c0_3, %c0_4, %c0_5] : memref<1x2x8x128xf32, #tpu.memory_space<vmem>>, vector<1x1x8x128xf32>
    %2 = vector.shape_cast %1 : vector<1x1x8x128xf32> to vector<1x8x128xf32>
    %3 = vector.shape_cast %0 : vector<1x8x128xf32> to vector<1x1x8x128xf32>
    tpu.vector_store %arg3[%c0_2, %c0_3, %c0_4, %c0_5], %3 {strides = array<i32>} : memref<1x2x8x128xf32, #tpu.memory_space<vmem>>, vector<1x1x8x128xf32>,
    %cst = arith.constant 1.000000e+00 : f32
    %4 = vector.broadcast %cst : f32 to vector<1x8x128xf32>
    %5 = arith.subf %4, %0 : vector<1x8x128xf32>
    %c0_6 = arith.constant 0 : index
    %c1 = arith.constant 1 : index
    %c0_7 = arith.constant 0 : index
    %c0_8 = arith.constant 0 : index
    %6 = vector.load %arg3[%c0_6, %c1, %c0_7, %c0_8] : memref<1x2x8x128xf32, #tpu.memory_space<vmem>>, vector<1x1x8x128xf32>
    %7 = vector.shape_cast %6 : vector<1x1x8x128xf32> to vector<1x8x128xf32>
    %8 = vector.shape_cast %5 : vector<1x8x128xf32> to vector<1x1x8x128xf32>
    tpu.vector_store %arg3[%c0_6, %c1, %c0_7, %c0_8], %8 {strides = array<i32>} : memref<1x2x8x128xf32, #tpu.memory_space<vmem>>, vector<1x1x8x128xf32>,
    return
  }
  func.func @transform_0(%arg0: i32, %arg1: i32) -> (i32, i32, i32) {
    %c0_i32 = arith.constant 0 : i32
    %c0_i32_0 = arith.constant 0 : i32
    return %arg0, %arg1, %c0_i32 : i32, i32, i32
  }
  func.func @transform_1(%arg0: i32, %arg1: i32) -> (i32, i32, i32, i32) {
    %c0_i32 = arith.constant 0 : i32
    %c0_i32_0 = arith.constant 0 : i32
    %c0_i32_1 = arith.constant 0 : i32
    return %arg0, %c0_i32, %arg1, %c0_i32_0 : i32, i32, i32, i32
  }
}

</mosaic_0001>

<bundles_post_ra>
// kernel: tpu_custom_call.1
= control target key start
LH: loop header
LB: loop body
LE: loop exit
PB: predicated region body
PF: predicated region fallthrough
CT: control target
= control target key end

     0   :  { %6 = vsyncpa [#allocation3], 0  ;;  %s584_s0 = inlined_call_operand.hbm [shape: f32[2,8,128], index: 0, kind: input, shape index: {}]   ;;  %s585_s1 = inlined_call_operand.hbm [shape: f32[2,2,8,128], index: 1, kind: output, shape index: {}]  }
   0x1   :  { %8 = vsyncpa [#allocation3 + $0x1], 0 }
   0x2   :  { %9 = vsyncpa [#allocation4], 0 }
   0x3   :  { %11 = vsyncpa [#allocation4 + $0x1], 0  ;;  %s463_s6 = smov 0   ;;  %s465_s7 = smov 0  }
   0x4   :  { %s467_s8 = smov 0   ;;  %s469_s9 = smov 0  }
   0x5   :  { %s471_s10 = smov 0   ;;  %s473_s11 = smov 0  }
   0x6 LB: > { %s257_s12 = sadd.s32 4294967295, %s449_s11   ;;  %s258_s13 = sadd.s32 4294967294, %s449_s11   ;;  %s449_s11 = sphi %s473_s11, %s17_s11   ;;  %s445_s10 = sphi %s471_s10, %s594_s10   ;;  %s441_s9 = sphi %s469_s9, %s593_s9   ;;  %s437_s8 = sphi %s467_s8, %s592_s8   ;;  %s433_s7 = sphi %s465_s7, %s591_s7   ;;  %s429_s6 = sphi %s463_s6, %s590_s6  }
   0x7   : > { %s29_s14 = sadd.s32 1, %s445_s10  ;;  %s38_s15 = sadd.s32 1, %s437_s8 }
   0x8   : > { %p31_p0 = scmp.ge.s32.totalorder %s29_s14, 2  ;;  %p45_p1 = scmp.ne.s32.totalorder %s437_s8, %s433_s7 }
   0x9   : > { %p46_p2 = scmp.eq.s32.totalorder %s449_s11, 0  ;;  %p51_p3 = scmp.ne.s32.totalorder %s433_s7, %s429_s6 }
   0xa   : > { %s596_s14 = smov (%p31_p0, %s29_s14), 0  ;;  %p52_p5 = scmp.eq.s32.totalorder %s257_s12, 0 }
   0xb   : > { %p504_p4 = por %p46_p2, %p45_p1  ;;  %s33_s17 = ssub.s32 %s445_s10, %s596_s14 }
   0xc   : > { %p77_p6 = scmp.eq.s32.totalorder %s257_s12, 1  ;;  %p36_p7 = scmp.eq.s32.totalorder %s33_s17, 0 }
   0xd   : > { %p510_p8 = por %p52_p5, %p51_p3  ;;  %p83_p10 = scmp.eq.s32.totalorder %s258_s13, 1 }
   0xe   : > { %p514_p9 = por %p77_p6, %p45_p1  ;;  %p260_p12 = scmp.ge.s32.totalorder %s449_s11, 2 }
   0xf   : > { %s519_s20 = scalar_select %p36_p7, %s437_s8, %s38_s15  }
  0x10   : > { %p521_p11 = por %p83_p10, %p51_p3  ;;  %p285_p13 = scmp.lt.s32.totalorder %s449_s11, 2 }
  0x11   : > { %s103_s22 = sand.u32 1, %s437_s8   ;;  %s262_s24 = sshll.u32 %s445_s10, 3 }
  0x12   : > { %s261_s23 = sshll.u32 %s103_s22, 3  ;;  %s112_s27 = scalar_lea.hbm %s584_s0, %s262_s24 }
  0x13   : > { %s107_s28 = scalar_lea.vmem [#allocation2], %s261_s23  ;;  %s114_s30 = sshll.u32 %s112_s27, 4  ;;  %s115_s30 = int_to_ptr.hbm [resolvable:$true] %s114_s30 }
  0x14   : > { %s116_s29 = sshll.u32 %s107_s28, 4  ;;  %p278_p0 = pnand %p285_p13, %p504_p4  ;;  %s117_s29 = int_to_ptr.vmem [resolvable:$true] %s116_s29 }
  0x15   : > { %p263_p1 = scmp.ge.s32.totalorder %s449_s11, 1  ;;  %p121_p2 = scmp.lt.s32.totalorder %s449_s11, 3 }
  0x16   : > { %s104_s2 = scalar_lea.sflag [#allocation3], %s103_s22 }
  0x17   : > { %280 = dma.hbm_to_vmem [thread:$0]  (!%p278_p0), %s115_s30, 128, %s117_s29, %s104_s2  }
  0x18   : > { %p122_p3 = pnand %p263_p1, %p121_p2 }
  0x19   : > { %s537_s3 = sand.u32 (!%p122_p3), 1, %s433_s7  }
  0x1a   : > { %125 = sbr.rel (%p122_p3) target bundleno = 48 (0x30), region = 24  ;;  %s264_s4 = sshll.u32 (!%p122_p3), %s537_s3, 3 }
  0x1b   : > { %s128_s5 = scalar_lea.sflag (!%p122_p3), [#allocation3], %s537_s3  ;;  %s131_s12 = scalar_lea.vmem (!%p122_p3), [#allocation2], %s264_s4 }
  0x1f   : > { %420 = dma.done.wait (%p510_p8), %s128_s5, 128  }
  0x20   : > { %422 = vsyncadd (%p510_p8), %s128_s5, 4294967168  ;;  %s265_s13 = sshll.u32 %s537_s3, 4  ;;  %s272_s15 = sshll.u32 %s441_s9, 4  ;;  %v151_v0 = vld [vmem:[%s131_s12] sm:$0xff] }
  0x21   : > { %s169_s22 = scalar_lea.hbm %s585_s1, %s272_s15  ;;  %s150_s23 = scalar_lea.vmem [#allocation5], %s265_s13  ;;  %v153_v1 = vsub.f32 1.0, %v151_v0 }
  0x22   : > { %s170_s24 = sshll.u32 %s150_s23, 4  ;;  %s172_s25 = sshll.u32 %s169_s22, 4  ;;  %152 = vst [vmem:[%s150_s23] sm:$0xff] %v151_v0  ;;  %s171_s24 = int_to_ptr.vmem [resolvable:$true] %s170_s24  ;;  %s173_s25 = int_to_ptr.hbm [resolvable:$true] %s172_s25 }
  0x23   : > { %266 = vst [vmem:[%s150_s23 + $0x8] sm:$0xff] %v153_v1  ;;  %s157_s18 = scalar_lea.sflag [#allocation4], %s537_s3  ;;  %s381_s26 = sshra.s32 %s173_s25, 4  ;;  %s382_s26 = int_to_ptr.hbm [resolvable:$true] %s381_s26 }
  0x24   : > { %s383_s27 = scalar_lea.hbm %s382_s26, 16  ;;  %s387_s29 = scalar_lea.hbm %s585_s1, 32 }
  0x25   : > { %p384_p4 = scmp.ne.s32.totalorder %s382_s26, %s383_s27  ;;  %p388_p7 = scmp.lt.s32.totalorder %s382_s26, %s585_s1 }
  0x26   : > { %p389_p8 = scmp.lt.s32.totalorder %s387_s29, %s383_s27 }
  0x27   : > { %p385_p5 = pnand %p384_p4, %p514_p9 }
  0x28   : > { %p390_p10 = por %p389_p8, %p388_p7 }
  0x29   : > { %p386_p6 = pneg %p385_p5 }
  0x2b   : > { %p391_p13 = pnand %p390_p10, %p386_p6 }
  0x2d   : > { %394 = shalt.err (!%p391_p13)
}
  0x2e   : > { %s451_s3 = smov 128   ;;  %s452_s4 = smov 8  }
  0x2f   : > { %275 = dma.vmem_to_hbm [thread:$0]  (%p514_p9), %s171_s24, 256, %s173_s25, %s157_s18, %s451_s3, %s451_s3, %s452_s4  }
  0x30 PF: > { %s187_s5 = sand.u32 1, %s429_s6   ;;  %p282_p0 = pnand %p260_p12, %p521_p11 }
  0x31   : > { %s188_s12 = scalar_lea.sflag [#allocation4], %s187_s5 }
  0x32   : > { %p283_p1 = pneg %p282_p0 }
  0x34   : > { %424 = dma.done.wait (%p283_p1), %s188_s12, 256  }
  0x35   : > { %426 = vsyncadd (%p283_p1), %s188_s12, 4294967040  ;;  %s17_s11 = sadd.s32 1, %s449_s11   ;;  %s590_s6 = smov %s433_s7 }
  0x36   : > { %p14_p2 = scmp.ge.s32.totalorder %s17_s11, 4   ;;  %s591_s7 = smov %s437_s8 }
  0x37   : > { %s592_s8 = smov %s519_s20  ;;  %s593_s9 = smov %s445_s10 }
  0x38   : > { %s594_s10 = smov %s596_s14  ;;  %16 = sbr.rel (!%p14_p2) target bundleno = 6 (0x6), region = 70 }
  0x3d   :  { %194 = vsyncpa [#allocation3], 1 }
  0x3e   :  { %196 = vsyncpa [#allocation3 + $0x1], 1 }
  0x3f   :  { %197 = vsyncpa [#allocation4], 1 }
  0x40   :  { %199 = vsyncpa [#allocation4 + $0x1], 1 }

</bundles_post_ra>
